<compile_context>
chip_gen: v7x
topology: tpu7x:2x2x1
jax: 0.10.0
libtpu: 0.0.40
codegen_flags: <defaults>
</compile_context>

<pallas_src>
import functools

import jax
import jax.numpy as jnp
from jax.experimental import pallas as pl
from jax.experimental.pallas import tpu as pltpu


# ---------------------------------------------------------------------------
# torch.view shape semantics (including -1 inference)
# ---------------------------------------------------------------------------
def _resolve_shape(total, shape):
    shape = list(shape)
    if -1 in shape:
        idx = shape.index(-1)
        known = 1
        for i, s in enumerate(shape):
            if i != idx:
                known *= int(s)
        assert known > 0 and total % known == 0, "view shape incompatible with input size"
        shape[idx] = total // known
    prod = 1
    for s in shape:
        prod *= int(s)
    assert prod == total, "view shape incompatible with input size"
    return tuple(int(s) for s in shape)


# ---------------------------------------------------------------------------
# Generation-aware sizing
# ---------------------------------------------------------------------------
_LANE_CAP = 16 * 1024                 # widest lane-dense last dim we will form
_BLOCK_BYTES_TARGET = 8 * 1024 * 1024  # ~8 MiB blocks; 4x resident (in+out, 2-deep)


@functools.lru_cache(maxsize=None)
def _vmem_limit_bytes():
    """48 MiB scoped limit on 64-MiB-VMEM parts (v7x), 64 MiB on 128-MiB parts."""
    phys = 64 * 1024 * 1024           # conservative default: v7x per-core VMEM
    try:
        info = pltpu.get_tpu_info()
        cap = getattr(info, "vmem_capacity_bytes", None)
        if cap:
            phys = int(cap)
    except Exception:
        pass
    return 64 * 1024 * 1024 if phys >= 96 * 1024 * 1024 else 48 * 1024 * 1024


def _sublane(dtype):
    # Packed sublane granularity: 8 rows for 32-bit, 16 for 16-bit, 32 for 8-bit.
    return max(8, 32 // jnp.dtype(dtype).itemsize)


def _pick_lane(total, cap=_LANE_CAP):
    """Largest multiple-of-128 divisor of `total` that is <= cap (None if total%128)."""
    if total % 128 != 0:
        return None
    m = total // 128
    for d in range(min(cap // 128, m), 0, -1):
        if m % d == 0:
            return 128 * d
    return 128


# ---------------------------------------------------------------------------
# VMEM-staged, tiled, double-buffered identity copy
# ---------------------------------------------------------------------------
def _copy_kernel(x_ref, o_ref):
    o_ref[...] = x_ref[...]


def _tiled_copy_2d(flat2d, *, alias_input=False):
    """Identity copy of a (rows, lane) slab via a tiled, pipelined Pallas kernel."""
    rows, lane = flat2d.shape
    itemsize = jnp.dtype(flat2d.dtype).itemsize
    sub = _sublane(flat2d.dtype)

    cap_rows = max(sub, (_BLOCK_BYTES_TARGET // (lane * itemsize)) // sub * sub)
    if rows > cap_rows:
        tile_rows = cap_rows                   # ragged last block handled by Pallas
    elif rows >= 2 * sub:
        # Keep >=2 grid steps so "parallel" can shard across v7x's two TensorCores.
        tile_rows = max(sub, ((rows // 2) // sub) * sub)
    else:
        tile_rows = rows                       # single full-extent block (always legal)
    grid = (pl.cdiv(rows, tile_rows),)

    return pl.pallas_call(
        _copy_kernel,
        out_shape=jax.ShapeDtypeStruct((rows, lane), flat2d.dtype),
        grid_spec=pltpu.PrefetchScalarGridSpec(
            num_scalar_prefetch=0,
            grid=grid,
            in_specs=[pl.BlockSpec((tile_rows, lane), lambda i: (i, 0))],
            out_specs=pl.BlockSpec((tile_rows, lane), lambda i: (i, 0)),
        ),
        # Safe: every grid step writes exactly the region it reads (identical
        # in/out BlockSpecs).  Off by default: without input donation XLA adds
        # a defensive copy, i.e. an extra HBM pass.
        input_output_aliases=({0: 0} if alias_input else {}),
        cost_estimate=pl.CostEstimate(
            flops=0, transcendentals=0,
            bytes_accessed=2 * rows * lane * itemsize),
        compiler_params=pltpu.CompilerParams(
            dimension_semantics=("parallel",),
            vmem_limit_bytes=_vmem_limit_bytes(),
        ),
    )(flat2d)


# ---------------------------------------------------------------------------
# Direct HBM->HBM DMA identity copy (no VMEM staging, no vld/vst pass)
# ---------------------------------------------------------------------------
_NUM_DMA = 4


def _make_dma_copy_kernel(row_chunks):
    def kernel(x_hbm, o_hbm, sems):
        copies = []
        for i, (start, size) in enumerate(row_chunks):
            cp = pltpu.make_async_copy(
                x_hbm.at[pl.ds(start, size)],
                o_hbm.at[pl.ds(start, size)],
                sems.at[i])
            cp.start()
            copies.append(cp)
        for cp in copies:
            cp.wait()
    return kernel


def _dma_copy_2d(flat2d):
    rows, lane = flat2d.shape
    itemsize = jnp.dtype(flat2d.dtype).itemsize
    n = min(_NUM_DMA, rows)
    base, rem = divmod(rows, n)
    chunks, start = [], 0
    for i in range(n):
        size = base + (1 if i < rem else 0)
        chunks.append((start, size))
        start += size

    return pl.pallas_call(
        _make_dma_copy_kernel(tuple(chunks)),
        out_shape=jax.ShapeDtypeStruct((rows, lane), flat2d.dtype),
        in_specs=[pl.BlockSpec(memory_space=pl.ANY)],
        out_specs=pl.BlockSpec(memory_space=pl.ANY),
        scratch_shapes=[pltpu.SemaphoreType.DMA((n,))],
        cost_estimate=pl.CostEstimate(
            flops=0, transcendentals=0,
            bytes_accessed=2 * rows * lane * itemsize),
    )(flat2d)


# ---------------------------------------------------------------------------
# Public entry point: View(shape)(x) == x.view(*shape)
# ---------------------------------------------------------------------------
def pallas_view(x, shape, force_copy=False, copy_impl="vmem", alias_input=False):
    """Equivalent of View(shape)(x) == x.view(*shape).

    Default path: metadata-only jnp.reshape (no kernel, zero HBM traffic) —
    exactly what torch.view does.  force_copy=True routes the bytes through a
    Pallas identity copy instead: copy_impl="vmem" (tiled, double-buffered
    VMEM-staged copy) or copy_impl="dma" (direct chunked HBM->HBM DMA).
    """
    total = int(x.size)
    target = _resolve_shape(total, shape)

    if not force_copy:
        return jnp.reshape(x, target)

    flat = jnp.reshape(x, (-1,))   # metadata-only: input is row-major contiguous

    if copy_impl == "dma" and total % 128 == 0:
        out2d = _dma_copy_2d(jnp.reshape(flat, (total // 128, 128)))
        return jnp.reshape(out2d, target)

    lane = _pick_lane(total)
    if lane is not None:
        out2d = _tiled_copy_2d(jnp.reshape(flat, (total // lane, lane)),
                               alias_input=alias_input)
        return jnp.reshape(out2d, target)

    # total % 128 != 0: copy the 1024-aligned prefix through the tiled kernel
    # and the tiny (<1024-element) tail through a single full-extent block —
    # no whole-tensor pad / ravel / slice round trips.
    prefix_len = (total // 1024) * 1024
    parts = []
    if prefix_len:
        plane = _pick_lane(prefix_len)
        pref2d = jnp.reshape(jax.lax.slice(flat, (0,), (prefix_len,)),
                             (prefix_len // plane, plane))
        parts.append(jnp.reshape(_tiled_copy_2d(pref2d, alias_input=alias_input), (-1,)))
    tail_len = total - prefix_len
    if tail_len:
        tail2d = jnp.reshape(jax.lax.slice(flat, (prefix_len,), (total,)), (1, tail_len))
        parts.append(jnp.reshape(_tiled_copy_2d(tail2d), (-1,)))
    out_flat = parts[0] if len(parts) == 1 else jnp.concatenate(parts)
    return jnp.reshape(out_flat, target)


if __name__ == "__main__":
    key = jax.random.PRNGKey(0)

    # NCHW input, flatten per-sample — the typical View usage.
    x = jax.random.normal(key, (2, 4, 16, 16), dtype=jnp.float32)
    view_shape = (2, -1)
    ref = jnp.reshape(x, (2, 4 * 16 * 16))

    # Default (recommended) path: metadata-only reshape, no kernel launch.
    out_fast = jax.block_until_ready(pallas_view(x, view_shape))
    # Pallas VMEM-tiled copy path (exercises the kernel).
    out_kernel = jax.block_until_ready(pallas_view(x, view_shape, force_copy=True))
    assert out_fast.shape == ref.shape and out_kernel.shape == ref.shape
    assert out_fast.dtype == ref.dtype and out_kernel.dtype == ref.dtype
    assert bool(jnp.all(out_fast == ref))
    assert bool(jnp.all(out_kernel == ref))

    # 1) Multi-step grid (>=2 blocks so v7x's two TensorCores both get work).
    y = jax.random.normal(jax.random.PRNGKey(1), (1024, 2048), dtype=jnp.float32)
    y_ref = jnp.reshape(y, (-1, 512))
    oy = jax.block_until_ready(pallas_view(y, (-1, 512), force_copy=True))
    assert bool(jnp.all(oy == y_ref))

    # 2) Direct HBM->HBM DMA variant (no VMEM staging).
    oy_dma = jax.block_until_ready(
        pallas_view(y, (-1, 512), force_copy=True, copy_impl="dma"))
    assert bool(jnp.all(oy_dma == y_ref))

    # 3) Ragged last block + opt-in input/output aliasing.
    z = jax.random.normal(jax.random.PRNGKey(2), (4097, 128), dtype=jnp.float32)
    oz = jax.block_until_ready(pallas_view(z, (-1,), force_copy=True, alias_input=True))
    assert bool(jnp.all(oz == jnp.reshape(z, (-1,))))

    # 4) bf16: tile rows align to the 16-row packed sublane granularity.
    b = jax.random.normal(jax.random.PRNGKey(4), (512, 1024), dtype=jnp.bfloat16)
    ob = jax.block_until_ready(pallas_view(b, (256, -1), force_copy=True))
    assert bool(jnp.all(ob == jnp.reshape(b, (256, 2048))))

    # 5) Total not a multiple of 128: aligned-prefix + tiny-tail path (no padding).
    w = jax.random.normal(jax.random.PRNGKey(3), (3, 5, 7, 11), dtype=jnp.float32)
    ow = jax.block_until_ready(pallas_view(w, (15, 77), force_copy=True))
    assert bool(jnp.all(ow == jnp.reshape(w, (15, 77))))

    print("KERNEL_OK")
</pallas_src>

<mosaic_0001>
module attributes {stable_mosaic.version = 11 : i64} {
  func.func @_copy_kernel(%arg0: i32, %arg1: memref<1x2048xf32, #tpu.memory_space<vmem>>, %arg2: memref<1x2048xf32, #tpu.memory_space<vmem>>) attributes {dimension_semantics = [#tpu.dimension_semantics<parallel>], iteration_bounds = array<i64: 1>, scalar_prefetch = 0 : i64, scratch_operands = 0 : i64, tpu.core_type = #tpu.core_type<tc>, window_params = [{transform_indices = @transform_0, window_bounds = array<i64: 1, 2048>}, {transform_indices = @transform_1, window_bounds = array<i64: 1, 2048>}]} {
    %c0 = arith.constant 0 : index
    %c0_0 = arith.constant 0 : index
    %0 = vector.load %arg1[%c0, %c0_0] : memref<1x2048xf32, #tpu.memory_space<vmem>>, vector<1x2048xf32>
    %c0_1 = arith.constant 0 : index
    %c0_2 = arith.constant 0 : index
    %1 = vector.load %arg2[%c0_1, %c0_2] : memref<1x2048xf32, #tpu.memory_space<vmem>>, vector<1x2048xf32>
    tpu.vector_store %arg2[%c0_1, %c0_2], %0 {strides = array<i32>} : memref<1x2048xf32, #tpu.memory_space<vmem>>, vector<1x2048xf32>,
    return
  }
  func.func @transform_0(%arg0: i32) -> (i32, i32) {
    %c0_i32 = arith.constant 0 : i32
    %c0_i32_0 = arith.constant 0 : i32
    return %arg0, %c0_i32 : i32, i32
  }
  func.func @transform_1(%arg0: i32) -> (i32, i32) {
    %c0_i32 = arith.constant 0 : i32
    %c0_i32_0 = arith.constant 0 : i32
    return %arg0, %c0_i32 : i32, i32
  }
}

</mosaic_0001>

<bundles_post_ra>
// kernel: tpu_custom_call.1
= control target key start
LH: loop header
LB: loop body
LE: loop exit
PB: predicated region body
PF: predicated region fallthrough
CT: control target
= control target key end

     0   :  { %6 = vsyncpa [#allocation3], 0  ;;  %s126_s0 = inlined_call_operand.hbm [shape: f32[1,2048], index: 0, kind: input, shape index: {}]   ;;  %s127_s1 = inlined_call_operand.hbm [shape: f32[1,2048], index: 1, kind: output, shape index: {}]  }
   0x1   :  { %7 = vsyncpa [#allocation4], 0  ;;  %s90_s6 = smov [#allocation2]   ;;  %s42_s10 = scalar_lea.hbm %s126_s0, 256 }
   0x2   :  { %s14_s7 = sshll.u32 %s90_s6, 4  ;;  %p43_p0 = scmp.ne.s32.totalorder %s126_s0, %s42_s10  ;;  %s15_s7 = int_to_ptr.vmem [resolvable:$true] %s14_s7 }
   0x3   :  { %p46_p1 = scmp.lt.u32.totalorder %s42_s10, %s126_s0 }
   0x5   :  { %p48_p2 = pnand %p46_p1, %p43_p0 }
   0x7   :  { %51 = shalt.err (!%p48_p2)
}
   0x8   :  { %s52_s15 = scalar_lea.vmem %s15_s7, 256  ;;  %p57_p4 = scmp.lt.s32.totalorder %s15_s7, %s15_s7 }
   0x9   :  { %p53_p3 = scmp.ne.s32.totalorder %s15_s7, %s52_s15  ;;  %p58_p5 = scmp.lt.s32.totalorder %s52_s15, %s52_s15 }
   0xb   :  { %p59_p6 = por %p58_p5, %p57_p4 }
   0xd   :  { %p60_p7 = pnand %p59_p6, %p53_p3 }
   0xf   :  { %63 = shalt.err (!%p60_p7)
}
  0x10   :  { %17 = dma.hbm_to_vmem [thread:$0]  %s126_s0, 256, %s15_s7, [#allocation3]  }
  0x11   :  { %86 = dma.done.wait [#allocation3], 256  }
  0x12   :  { %87 = vsyncadd [#allocation3], 4294967040  ;;  %s91_s18 = smov [#allocation5]   ;;  %v21_v0 = vld [vmem:[#allocation2] sm:$0xff]  ;;  %v22_v1 = vld [vmem:[#allocation2 + $0x8] sm:$0xff] }
  0x13   :  { %s31_s19 = sshll.u32 %s91_s18, 4  ;;  %23 = vst [vmem:[#allocation5] sm:$0xff] %v21_v0  ;;  %24 = vst [vmem:[#allocation5 + $0x8] sm:$0xff] %v22_v1  ;;  %s32_s19 = int_to_ptr.vmem [resolvable:$true] %s31_s19 }
  0x14   :  { %s64_s20 = scalar_lea.vmem %s32_s19, 256  ;;  %p69_p9 = scmp.lt.s32.totalorder %s32_s19, %s32_s19 }
  0x15   :  { %p65_p8 = scmp.ne.s32.totalorder %s32_s19, %s64_s20  ;;  %p70_p10 = scmp.lt.s32.totalorder %s64_s20, %s64_s20 }
  0x17   :  { %p71_p11 = por %p70_p10, %p69_p9 }
  0x19   :  { %p72_p12 = pnand %p71_p11, %p65_p8 }
  0x1b   :  { %75 = shalt.err (!%p72_p12)
}
  0x1c   :  { %s76_s0 = scalar_lea.hbm %s127_s1, 256 }
  0x1d   :  { %p77_p13 = scmp.ne.s32.totalorder %s127_s1, %s76_s0  ;;  %p80_p0 = scmp.lt.u32.totalorder %s76_s0, %s127_s1 }
  0x1f   :  { %p82_p1 = pnand %p80_p0, %p77_p13 }
  0x21   :  { %85 = shalt.err (!%p82_p1)
}
  0x22   :  { %34 = dma.vmem_to_hbm [thread:$0]  %s32_s19, 256, %s127_s1, [#allocation4]  }
  0x23   :  { %88 = dma.done.wait [#allocation4], 256  }
  0x24   :  { %89 = vsyncadd [#allocation4], 4294967040 }
  0x25   :  { %38 = vsyncpa [#allocation3], 1 }
  0x26   :  { %39 = vsyncpa [#allocation4], 1 }

</bundles_post_ra>
